<compile_context>
chip_gen: v7x
topology: tpu7x:2x2x1
jax: 0.10.0
libtpu: 0.0.40
codegen_flags: <defaults>
</compile_context>

<pallas_src>
import functools
import math
import re

import jax
import jax.numpy as jnp
from jax import lax
from jax.experimental import pallas as pl
from jax.experimental.pallas import tpu as pltpu

_MIB = 1024 * 1024


def _round_up(n: int, m: int) -> int:
    return ((n + m - 1) // m) * m


def _nbytes(shape, dtype) -> int:
    return math.prod(shape) * jnp.dtype(dtype).itemsize


def _tpu_generation():
    """Best-effort TPU generation from device_kind (e.g. 'TPU v6e' -> 6)."""
    try:
        kind = jax.devices()[0].device_kind.lower()
        m = re.search(r"(\d+)", kind)
        return int(m.group(1)) if m else None
    except Exception:
        return None


def _vmem_capacity_bytes() -> int:
    """Physical VMEM per TensorCore; conservative fallback if unqueryable."""
    try:
        cap = int(pltpu.get_tpu_info().vmem_capacity_bytes)
        if cap > 0:
            return cap
    except Exception:
        pass
    gen = _tpu_generation()
    if gen is None:
        return 64 * _MIB               # unknown: assume the smallest (v7x-like)
    return 64 * _MIB if gen >= 7 else 128 * _MIB


# --------------------------------------------------------------------------
# Pass 1: fused Q/K/V projection  (runs ONCE per row of X — review item #1)
# --------------------------------------------------------------------------
def _qkv_proj_kernel(x_ref, w_ref, q_ref, k_ref, v_ref, *, qk_pad, inv_scale):
    """x_ref: (1, ts, D); w_ref: (D, 2*QKP + DVP) zero-padded [Wq|Wk|Wv].

    Outputs: q (1, ts, QKP) pre-scaled by 1/sqrt(dqk), k (1, ts, QKP),
    v (1, ts, DVP), all in the matmul dtype.  Slice boundaries are 128-aligned
    so these are clean lane slices of the single fused MXU result.
    """
    proj = jnp.dot(x_ref[0], w_ref[...], preferred_element_type=jnp.float32)
    q_ref[0] = (proj[:, :qk_pad] * inv_scale).astype(q_ref.dtype)
    k_ref[0] = proj[:, qk_pad:2 * qk_pad].astype(k_ref.dtype)
    v_ref[0] = proj[:, 2 * qk_pad:].astype(v_ref.dtype)


def _project_qkv(x_mm, w_all, *, ts, qk_pad, v_pad, inv_scale, matmul_dtype,
                 vmem_limit, cost, single_buffer_weights):
    B, S, D = x_mm.shape
    wtot = w_all.shape[1]

    w_kwargs = {}
    if single_buffer_weights:
        # Constant index_map -> one buffer is enough (review item #4).
        w_kwargs = dict(pipeline_mode=pl.Buffered(1))

    kernel = functools.partial(_qkv_proj_kernel, qk_pad=qk_pad,
                               inv_scale=inv_scale)
    return pl.pallas_call(
        kernel,
        out_shape=(
            jax.ShapeDtypeStruct((B, S, qk_pad), matmul_dtype),
            jax.ShapeDtypeStruct((B, S, qk_pad), matmul_dtype),
            jax.ShapeDtypeStruct((B, S, v_pad), matmul_dtype),
        ),
        grid_spec=pltpu.PrefetchScalarGridSpec(
            num_scalar_prefetch=0,
            grid=(B, S // ts),
            in_specs=[
                pl.BlockSpec((1, ts, D), lambda b, si: (b, si, 0)),
                pl.BlockSpec((D, wtot), lambda b, si: (0, 0), **w_kwargs),
            ],
            out_specs=(
                pl.BlockSpec((1, ts, qk_pad), lambda b, si: (b, si, 0)),
                pl.BlockSpec((1, ts, qk_pad), lambda b, si: (b, si, 0)),
                pl.BlockSpec((1, ts, v_pad), lambda b, si: (b, si, 0)),
            ),
        ),
        compiler_params=pltpu.CompilerParams(
            dimension_semantics=("parallel", "parallel"),
            vmem_limit_bytes=vmem_limit,
        ),
        cost_estimate=cost,
    )(x_mm, w_all)


# --------------------------------------------------------------------------
# Pass 2: flash attention over precomputed Q/K/V
# --------------------------------------------------------------------------
def _flash_attn_kernel(q_ref, k_ref, v_ref, o_ref, m_s, l_s, acc_s,
                       *, out_dim, matmul_dtype, prob_dtype):
    """One (batch, q-tile, kv-tile) step of online-softmax attention.

    q_ref: (1, tq, QKP)  pre-scaled Q tile       (matmul dtype)
    k_ref: (1, tk, QKP)  K tile                  (matmul dtype)
    v_ref: (1, tk, DVP)  V tile                  (matmul dtype)
    o_ref: (1, tq, Dv)   output tile (true width; masked store if Dv < 128)
    m_s/l_s: (tq, 1) f32 running max / running softmax sum
    acc_s  : (tq, DVP) f32 running weighted-V accumulator
    """
    ki = pl.program_id(2)

    @pl.when(ki == 0)
    def _init():
        m_s[...] = jnp.full(m_s.shape, -jnp.inf, dtype=m_s.dtype)
        l_s[...] = jnp.zeros(l_s.shape, dtype=l_s.dtype)
        acc_s[...] = jnp.zeros(acc_s.shape, dtype=acc_s.dtype)

    # scores = (Q/sqrt(dqk)) K^T without materializing a transpose: NT
    # contraction over the last axes (Mosaic folds it into the MXU load).
    s = lax.dot_general(q_ref[0], k_ref[0], (((1,), (1,)), ((), ())),
                        preferred_element_type=jnp.float32)        # (tq, tk)

    # Online softmax; statistics stay in f32, probabilities optionally bf16
    # (v6e/v7x only — review item #5).  f32-accumulated row sum either way.
    m_prev = m_s[...]
    m_new = jnp.maximum(m_prev, jnp.max(s, axis=-1, keepdims=True))
    alpha = jnp.exp(m_prev - m_new)
    p = jnp.exp((s - m_new).astype(prob_dtype))
    l_s[...] = alpha * l_s[...] + jnp.sum(p, axis=-1, keepdims=True,
                                          dtype=jnp.float32)
    acc_s[...] = alpha * acc_s[...] + jnp.dot(
        p.astype(matmul_dtype), v_ref[0], preferred_element_type=jnp.float32)
    m_s[...] = m_new

    @pl.when(ki == pl.num_programs(2) - 1)
    def _finalize():
        # Exact normalizer: a (tq,1) divide once per query tile is free.
        out = acc_s[...] / l_s[...]
        o_ref[0] = out[:, :out_dim].astype(o_ref.dtype)


# --------------------------------------------------------------------------
# Wrapper
# --------------------------------------------------------------------------
def self_attention(x, w_q, w_k, w_v, *, matmul_dtype=jnp.bfloat16,
                   q_tile=None, kv_tile=None):
    """x: (B, S, input_dim). Returns (B, S, v_dim) with the dtype of x."""
    B, S, D = x.shape
    Dqk = w_q.shape[1]
    Dv = w_v.shape[1]
    assert w_q.shape == (D, Dqk) and w_k.shape == (D, Dqk) and w_v.shape == (D, Dv)

    QKP = _round_up(Dqk, 128)            # lane-dense Q/K width
    DVP = _round_up(Dv, 128)             # lane-dense V / accumulator width
    WTOT = 2 * QKP + DVP
    inv_scale = 1.0 / (float(Dqk) ** 0.5)

    vmem_cap = _vmem_capacity_bytes()
    vmem_ceiling = int(0.75 * vmem_cap)  # headroom for compiler-internal scratch
    gen = _tpu_generation()

    # Generation-aware tile defaults: 256 on 64 MiB-VMEM parts (v7x), 512 on
    # 128 MiB parts (v5e/v6e).  NOTE: full bidirectional attention, S must
    # divide the tiles (module contract — no masking / ragged lengths).
    default_tile = 256 if vmem_cap <= 64 * _MIB else 512
    tq = q_tile if q_tile is not None else min(S, default_tile)
    tk = kv_tile if kv_tile is not None else min(S, default_tile)
    assert S % tq == 0 and S % tk == 0, "sequence length must divide the tiles"
    nq, nk = S // tq, S // tk

    # bf16 probabilities only where the VPU/EUP have bf16 support.
    prob_dtype = (jnp.bfloat16
                  if (matmul_dtype == jnp.bfloat16 and gen is not None and gen >= 6)
                  else jnp.float32)

    # Fused, zero-padded [Wq | Wk | Wv] (padding columns contribute exact 0s).
    w_all = jnp.zeros((D, WTOT), jnp.float32)
    w_all = w_all.at[:, :Dqk].set(w_q.astype(jnp.float32))
    w_all = w_all.at[:, QKP:QKP + Dqk].set(w_k.astype(jnp.float32))
    w_all = w_all.at[:, 2 * QKP:2 * QKP + Dv].set(w_v.astype(jnp.float32))
    w_all = w_all.astype(matmul_dtype)
    x_mm = x.astype(matmul_dtype)

    # ---------------- projection pass ----------------
    def proj_bytes(ts_):
        return (2 * _nbytes((1, ts_, D), matmul_dtype)            # X blocks
                + 2 * _nbytes((D, WTOT), matmul_dtype)            # weight
                + 2 * (2 * _nbytes((1, ts_, QKP), matmul_dtype)
                       + _nbytes((1, ts_, DVP), matmul_dtype)))   # outputs

    ts = tq
    while proj_bytes(ts) > vmem_ceiling and ts > 8 and S % (ts // 2) == 0:
        ts //= 2                          # shrink row tile for very large D
    proj_vmem = int(min(max(proj_bytes(ts) + 4 * _MIB, 32 * _MIB), vmem_ceiling))
    proj_cost = pl.CostEstimate(
        flops=int(2 * B * S * D * WTOT),
        transcendentals=0,
        bytes_accessed=int(_nbytes((B, S, D), matmul_dtype)
                           + _nbytes((D, WTOT), matmul_dtype)
                           + _nbytes((B, S, WTOT), matmul_dtype)))

    proj_kwargs = dict(ts=ts, qk_pad=QKP, v_pad=DVP, inv_scale=inv_scale,
                       matmul_dtype=matmul_dtype, vmem_limit=proj_vmem,
                       cost=proj_cost)
    try:
        q, k, v = _project_qkv(x_mm, w_all, single_buffer_weights=True,
                               **proj_kwargs)
    except Exception:
        # Pallas build without BlockSpec pipeline_mode support: plain specs.
        q, k, v = _project_qkv(x_mm, w_all, single_buffer_weights=False,
                               **proj_kwargs)

    # ---------------- flash attention pass ----------------
    flash_bytes = (2 * (_nbytes((1, tq, QKP), matmul_dtype)
                        + _nbytes((1, tk, QKP), matmul_dtype)
                        + _nbytes((1, tk, DVP), matmul_dtype)
                        + _nbytes((1, tq, Dv), x.dtype))
                   + 2 * _nbytes((tq, 128), jnp.float32)     # m, l (lane-padded)
                   + _nbytes((tq, DVP), jnp.float32)         # accumulator
                   + 2 * _nbytes((tq, tk), jnp.float32))     # score intermediates
    flash_vmem = int(min(max(flash_bytes + 4 * _MIB, 32 * _MIB), vmem_ceiling))
    flash_cost = pl.CostEstimate(
        flops=int(2 * B * S * S * QKP + 2 * B * S * S * DVP),
        transcendentals=int(B * S * S + B * S * nk),
        bytes_accessed=int(_nbytes((B, S, QKP), matmul_dtype)
                           + nq * _nbytes((B, S, QKP + DVP), matmul_dtype)
                           + _nbytes((B, S, Dv), x.dtype)))

    flash_kernel = functools.partial(
        _flash_attn_kernel, out_dim=Dv, matmul_dtype=matmul_dtype,
        prob_dtype=prob_dtype)

    out = pl.pallas_call(
        flash_kernel,
        out_shape=jax.ShapeDtypeStruct((B, S, Dv), x.dtype),
        grid_spec=pltpu.PrefetchScalarGridSpec(
            num_scalar_prefetch=0,
            grid=(B, nq, nk),
            in_specs=[
                pl.BlockSpec((1, tq, QKP), lambda b, qi, ki: (b, qi, 0)),  # Q
                pl.BlockSpec((1, tk, QKP), lambda b, qi, ki: (b, ki, 0)),  # K
                pl.BlockSpec((1, tk, DVP), lambda b, qi, ki: (b, ki, 0)),  # V
            ],
            out_specs=pl.BlockSpec((1, tq, Dv), lambda b, qi, ki: (b, qi, 0)),
            scratch_shapes=[
                pltpu.VMEM((tq, 1), jnp.float32),     # running max
                pltpu.VMEM((tq, 1), jnp.float32),     # running sum
                pltpu.VMEM((tq, DVP), jnp.float32),   # output accumulator
            ],
        ),
        compiler_params=pltpu.CompilerParams(
            dimension_semantics=("parallel", "parallel", "arbitrary"),
            vmem_limit_bytes=flash_vmem,
        ),
        cost_estimate=flash_cost,
    )(q, k, v)

    return out


# --------------------------------------------------------------------------
# Reference (precision-matched to the kernel's matmul dtype policy)
# --------------------------------------------------------------------------
def _reference(x, w_q, w_k, w_v, matmul_dtype=jnp.float32):
    """Module math (softmax(QK^T / sqrt(dqk)) @ V) with matmul operands cast to
    `matmul_dtype` and f32 accumulation.  For matmul_dtype=f32 this is exactly
    the PyTorch module's forward."""
    f32 = jnp.float32
    inv_scale = 1.0 / (float(w_q.shape[1]) ** 0.5)
    xm = x.astype(matmul_dtype)
    q = jnp.dot(xm, w_q.astype(matmul_dtype), preferred_element_type=f32) * inv_scale
    k = jnp.dot(xm, w_k.astype(matmul_dtype), preferred_element_type=f32)
    v = jnp.dot(xm, w_v.astype(matmul_dtype), preferred_element_type=f32)
    s = jnp.einsum('bqd,bkd->bqk', q.astype(matmul_dtype), k.astype(matmul_dtype),
                   preferred_element_type=f32)
    p = jax.nn.softmax(s, axis=-1)
    return jnp.einsum('bqk,bkd->bqd', p.astype(matmul_dtype), v.astype(matmul_dtype),
                      preferred_element_type=f32)


if __name__ == "__main__":
    B, S = 2, 8
    input_dim, qk_dim, v_dim = 32, 16, 32

    key = jax.random.PRNGKey(0)
    kx, kq, kk, kv = jax.random.split(key, 4)

    x = jax.random.normal(kx, (B, S, input_dim), dtype=jnp.float32)
    # torch.rand -> U[0, 1), reproduced deterministically here
    w_q = jax.random.uniform(kq, (input_dim, qk_dim), dtype=jnp.float32)
    w_k = jax.random.uniform(kk, (input_dim, qk_dim), dtype=jnp.float32)
    w_v = jax.random.uniform(kv, (input_dim, v_dim), dtype=jnp.float32)

    # f32-matmul run: algorithm check against the plain module math.  Tolerance
    # covers MXU precision-pass differences vs XLA's default f32 dot precision
    # (the softmax normalizer itself is now exact).
    out_f32 = jax.block_until_ready(
        self_attention(x, w_q, w_k, w_v, matmul_dtype=jnp.float32))
    ref_f32 = _reference(x, w_q, w_k, w_v, jnp.float32)
    assert out_f32.shape == (B, S, v_dim)
    assert jnp.allclose(out_f32, ref_f32, atol=1e-2, rtol=1e-2), "f32 mismatch"

    # bf16-matmul run (the fast MXU path): f32 accumulation, f32 softmax stats,
    # checked against a precision-matched reference.
    out_bf16 = jax.block_until_ready(
        self_attention(x, w_q, w_k, w_v, matmul_dtype=jnp.bfloat16))
    ref_bf16 = _reference(x, w_q, w_k, w_v, jnp.bfloat16)
    assert out_bf16.shape == (B, S, v_dim)
    assert jnp.allclose(out_bf16, ref_bf16, atol=5e-2, rtol=5e-2), "bf16 mismatch"

    print("KERNEL_OK")
</pallas_src>

<mosaic_0001>
module attributes {stable_mosaic.version = 11 : i64} {
  func.func @_qkv_proj_kernel(%arg0: i32, %arg1: i32, %arg2: memref<1x8x32xf32, #tpu.memory_space<vmem>>, %arg3: memref<32x384xf32, #tpu.memory_space<vmem>>, %arg4: memref<1x8x128xf32, #tpu.memory_space<vmem>>, %arg5: memref<1x8x128xf32, #tpu.memory_space<vmem>>, %arg6: memref<1x8x128xf32, #tpu.memory_space<vmem>>) attributes {dimension_semantics = [#tpu.dimension_semantics<parallel>, #tpu.dimension_semantics<parallel>], iteration_bounds = array<i64: 2, 1>, scalar_prefetch = 0 : i64, scratch_operands = 0 : i64, tpu.core_type = #tpu.core_type<tc>, window_params = [{transform_indices = @transform_0, window_bounds = array<i64: 1, 8, 32>}, {pipeline_mode = #tpu.pipeline_mode<synchronous>, transform_indices = @transform_1, window_bounds = array<i64: 32, 384>}, {transform_indices = @transform_2, window_bounds = array<i64: 1, 8, 128>}, {transform_indices = @transform_3, window_bounds = array<i64: 1, 8, 128>}, {transform_indices = @transform_4, window_bounds = array<i64: 1, 8, 128>}]} {
    %c0 = arith.constant 0 : index
    %c0_0 = arith.constant 0 : index
    %c0_1 = arith.constant 0 : index
    %0 = vector.load %arg2[%c0, %c0_0, %c0_1] : memref<1x8x32xf32, #tpu.memory_space<vmem>>, vector<1x8x32xf32>
    %1 = vector.shape_cast %0 : vector<1x8x32xf32> to vector<8x32xf32>
    %c0_2 = arith.constant 0 : index
    %c0_3 = arith.constant 0 : index
    %2 = vector.load %arg3[%c0_2, %c0_3] : memref<32x384xf32, #tpu.memory_space<vmem>>, vector<32x384xf32>
    %cst = arith.constant dense<0.000000e+00> : vector<8x384xf32>
    %3 = tpu.matmul %1, %2, %cst {dimension_numbers = #tpu.dot_dimension_numbers<[1], [0], [0], [1], [0, 0, 1, 1], [], []>} : vector<8x32xf32>, vector<32x384xf32>, vector<8x384xf32> -> vector<8x384xf32>
    %4 = vector.extract_strided_slice %3 {offsets = [0, 0], sizes = [8, 128], strides = [1, 1]} : vector<8x384xf32> to vector<8x128xf32>
    %cst_4 = arith.constant 2.500000e-01 : f32
    %5 = vector.broadcast %cst_4 : f32 to vector<8x128xf32>
    %6 = arith.mulf %4, %5 : vector<8x128xf32>
    %c0_5 = arith.constant 0 : index
    %c0_6 = arith.constant 0 : index
    %c0_7 = arith.constant 0 : index
    %7 = vector.load %arg4[%c0_5, %c0_6, %c0_7] : memref<1x8x128xf32, #tpu.memory_space<vmem>>, vector<1x8x128xf32>
    %8 = vector.shape_cast %7 : vector<1x8x128xf32> to vector<8x128xf32>
    %9 = vector.shape_cast %6 : vector<8x128xf32> to vector<1x8x128xf32>
    tpu.vector_store %arg4[%c0_5, %c0_6, %c0_7], %9 {strides = array<i32>} : memref<1x8x128xf32, #tpu.memory_space<vmem>>, vector<1x8x128xf32>,
    %10 = vector.extract_strided_slice %3 {offsets = [0, 128], sizes = [8, 128], strides = [1, 1]} : vector<8x384xf32> to vector<8x128xf32>
    %c0_8 = arith.constant 0 : index
    %c0_9 = arith.constant 0 : index
    %c0_10 = arith.constant 0 : index
    %11 = vector.load %arg5[%c0_8, %c0_9, %c0_10] : memref<1x8x128xf32, #tpu.memory_space<vmem>>, vector<1x8x128xf32>
    %12 = vector.shape_cast %11 : vector<1x8x128xf32> to vector<8x128xf32>
    %13 = vector.shape_cast %10 : vector<8x128xf32> to vector<1x8x128xf32>
    tpu.vector_store %arg5[%c0_8, %c0_9, %c0_10], %13 {strides = array<i32>} : memref<1x8x128xf32, #tpu.memory_space<vmem>>, vector<1x8x128xf32>,
    %14 = vector.extract_strided_slice %3 {offsets = [0, 256], sizes = [8, 128], strides = [1, 1]} : vector<8x384xf32> to vector<8x128xf32>
    %c0_11 = arith.constant 0 : index
    %c0_12 = arith.constant 0 : index
    %c0_13 = arith.constant 0 : index
    %15 = vector.load %arg6[%c0_11, %c0_12, %c0_13] : memref<1x8x128xf32, #tpu.memory_space<vmem>>, vector<1x8x128xf32>
    %16 = vector.shape_cast %15 : vector<1x8x128xf32> to vector<8x128xf32>
    %17 = vector.shape_cast %14 : vector<8x128xf32> to vector<1x8x128xf32>
    tpu.vector_store %arg6[%c0_11, %c0_12, %c0_13], %17 {strides = array<i32>} : memref<1x8x128xf32, #tpu.memory_space<vmem>>, vector<1x8x128xf32>,
    return
  }
  func.func @transform_0(%arg0: i32, %arg1: i32) -> (i32, i32, i32) {
    %c0_i32 = arith.constant 0 : i32
    %c0_i32_0 = arith.constant 0 : i32
    return %arg0, %arg1, %c0_i32 : i32, i32, i32
  }
  func.func @transform_1(%arg0: i32, %arg1: i32) -> (i32, i32) {
    %c0_i32 = arith.constant 0 : i32
    %c0_i32_0 = arith.constant 0 : i32
    %c0_i32_1 = arith.constant 0 : i32
    return %c0_i32, %c0_i32_0 : i32, i32
  }
  func.func @transform_2(%arg0: i32, %arg1: i32) -> (i32, i32, i32) {
    %c0_i32 = arith.constant 0 : i32
    %c0_i32_0 = arith.constant 0 : i32
    return %arg0, %arg1, %c0_i32 : i32, i32, i32
  }
  func.func @transform_3(%arg0: i32, %arg1: i32) -> (i32, i32, i32) {
    %c0_i32 = arith.constant 0 : i32
    %c0_i32_0 = arith.constant 0 : i32
    return %arg0, %arg1, %c0_i32 : i32, i32, i32
  }
  func.func @transform_4(%arg0: i32, %arg1: i32) -> (i32, i32, i32) {
    %c0_i32 = arith.constant 0 : i32
    %c0_i32_0 = arith.constant 0 : i32
    return %arg0, %arg1, %c0_i32 : i32, i32, i32
  }
}

module attributes {stable_mosaic.version = 11 : i64} {
  func.func @_qkv_proj_kernel(%arg0: i32, %arg1: i32, %arg2: memref<1x8x32xf32, #tpu.memory_space<vmem>>, %arg3: memref<32x384xf32, #tpu.memory_space<vmem>>, %arg4: memref<1x8x128xf32, #tpu.memory_space<vmem>>, %arg5: memref<1x8x128xf32, #tpu.memory_space<vmem>>, %arg6: memref<1x8x128xf32, #tpu.memory_space<vmem>>) attributes {dimension_semantics = [#tpu.dimension_semantics<parallel>, #tpu.dimension_semantics<parallel>], iteration_bounds = array<i64: 2, 1>, scalar_prefetch = 0 : i64, scratch_operands = 0 : i64, tpu.core_type = #tpu.core_type<tc>, window_params = [{transform_indices = @transform_0, window_bounds = array<i64: 1, 8, 32>}, {pipeline_mode = #tpu.pipeline_mode<synchronous>, transform_indices = @transform_1, window_bounds = array<i64: 32, 384>}, {transform_indices = @transform_2, window_bounds = array<i64: 1, 8, 128>}, {transform_indices = @transform_3, window_bounds = array<i64: 1, 8, 128>}, {transform_indices = @transform_4, window_bounds = array<i64: 1, 8, 128>}]} {
    %c0 = arith.constant 0 : index
    %c0_0 = arith.constant 0 : index
    %c0_1 = arith.constant 0 : index
    %0 = vector.load %arg2[%c0, %c0_0, %c0_1] : memref<1x8x32xf32, #tpu.memory_space<vmem>>, vector<1x8x32xf32>
    %1 = vector.shape_cast %0 : vector<1x8x32xf32> to vector<8x32xf32>
    %c0_2 = arith.constant 0 : index
    %c0_3 = arith.constant 0 : index
    %2 = vector.load %arg3[%c0_2, %c0_3] : memref<32x384xf32, #tpu.memory_space<vmem>>, vector<32x384xf32>
    %cst = arith.constant dense<0.000000e+00> : vector<8x384xf32>
    %3 = tpu.matmul %1, %2, %cst {dimension_numbers = #tpu.dot_dimension_numbers<[1], [0], [0], [1], [0, 0, 1, 1], [], []>} : vector<8x32xf32>, vector<32x384xf32>, vector<8x384xf32> -> vector<8x384xf32>
    %4 = vector.extract_strided_slice %3 {offsets = [0, 0], sizes = [8, 128], strides = [1, 1]} : vector<8x384xf32> to vector<8x128xf32>
    %cst_4 = arith.constant 2.500000e-01 : f32
    %5 = vector.broadcast %cst_4 : f32 to vector<8x128xf32>
    %6 = arith.mulf %4, %5 : vector<8x128xf32>
    %c0_5 = arith.constant 0 : index
    %c0_6 = arith.constant 0 : index
    %c0_7 = arith.constant 0 : index
    %7 = vector.load %arg4[%c0_5, %c0_6, %c0_7] : memref<1x8x128xf32, #tpu.memory_space<vmem>>, vector<1x8x128xf32>
    %8 = vector.shape_cast %7 : vector<1x8x128xf32> to vector<8x128xf32>
    %9 = vector.shape_cast %6 : vector<8x128xf32> to vector<1x8x128xf32>
    tpu.vector_store %arg4[%c0_5, %c0_6, %c0_7], %9 {strides = array<i32>} : memref<1x8x128xf32, #tpu.memory_space<vmem>>, vector<1x8x128xf32>,
    %10 = vector.extract_strided_slice %3 {offsets = [0, 128], sizes = [8, 128], strides = [1, 1]} : vector<8x384xf32> to vector<8x128xf32>
    %c0_8 = arith.constant 0 : index
    %c0_9 = arith.constant 0 : index
    %c0_10 = arith.constant 0 : index
    %11 = vector.load %arg5[%c0_8, %c0_9, %c0_10] : memref<1x8x128xf32, #tpu.memory_space<vmem>>, vector<1x8x128xf32>
    %12 = vector.shape_cast %11 : vector<1x8x128xf32> to vector<8x128xf32>
    %13 = vector.shape_cast %10 : vector<8x128xf32> to vector<1x8x128xf32>
    tpu.vector_store %arg5[%c0_8, %c0_9, %c0_10], %13 {strides = array<i32>} : memref<1x8x128xf32, #tpu.memory_space<vmem>>, vector<1x8x128xf32>,
    %14 = vector.extract_strided_slice %3 {offsets = [0, 256], sizes = [8, 128], strides = [1, 1]} : vector<8x384xf32> to vector<8x128xf32>
    %c0_11 = arith.constant 0 : index
    %c0_12 = arith.constant 0 : index
    %c0_13 = arith.constant 0 : index
    %15 = vector.load %arg6[%c0_11, %c0_12, %c0_13] : memref<1x8x128xf32, #tpu.memory_space<vmem>>, vector<1x8x128xf32>
    %16 = vector.shape_cast %15 : vector<1x8x128xf32> to vector<8x128xf32>
    %17 = vector.shape_cast %14 : vector<8x128xf32> to vector<1x8x128xf32>
    tpu.vector_store %arg6[%c0_11, %c0_12, %c0_13], %17 {strides = array<i32>} : memref<1x8x128xf32, #tpu.memory_space<vmem>>, vector<1x8x128xf32>,
    return
  }
  func.func @transform_0(%arg0: i32, %arg1: i32) -> (i32, i32, i32) {
    %c0_i32 = arith.constant 0 : i32
    %c0_i32_0 = arith.constant 0 : i32
    return %arg0, %arg1, %c0_i32 : i32, i32, i32
  }
  func.func @transform_1(%arg0: i32, %arg1: i32) -> (i32, i32) {
    %c0_i32 = arith.constant 0 : i32
    %c0_i32_0 = arith.constant 0 : i32
    %c0_i32_1 = arith.constant 0 : i32
    return %c0_i32, %c0_i32_0 : i32, i32
  }
  func.func @transform_2(%arg0: i32, %arg1: i32) -> (i32, i32, i32) {
    %c0_i32 = arith.constant 0 : i32
    %c0_i32_0 = arith.constant 0 : i32
    return %arg0, %arg1, %c0_i32 : i32, i32, i32
  }
  func.func @transform_3(%arg0: i32, %arg1: i32) -> (i32, i32, i32) {
    %c0_i32 = arith.constant 0 : i32
    %c0_i32_0 = arith.constant 0 : i32
    return %arg0, %arg1, %c0_i32 : i32, i32, i32
  }
  func.func @transform_4(%arg0: i32, %arg1: i32) -> (i32, i32, i32) {
    %c0_i32 = arith.constant 0 : i32
    %c0_i32_0 = arith.constant 0 : i32
    return %arg0, %arg1, %c0_i32 : i32, i32, i32
  }
}

</mosaic_0001>

<bundles_post_ra>
// kernel: tpu_custom_call.1
= control target key start
LH: loop header
LB: loop body
LE: loop exit
PB: predicated region body
PF: predicated region fallthrough
CT: control target
= control target key end

     0   :  { %s1300_s0 = inlined_call_operand.hbm [shape: f32[2,8,32], index: 0, kind: input, shape index: {}]   ;;  %s1301_s1 = inlined_call_operand.hbm [shape: f32[32,384], index: 1, kind: input, shape index: {}]   ;;  %s1302_s2 = inlined_call_operand.hbm [shape: f32[2,8,128], index: 2, kind: output, shape index: {0}]   ;;  %s1303_s3 = inlined_call_operand.hbm [shape: f32[2,8,128], index: 3, kind: output, shape index: {1}]   ;;  %s1304_s4 = inlined_call_operand.hbm [shape: f32[2,8,128], index: 4, kind: output, shape index: {2}]  }
   0x1   :  { %1309 = sst [smem:[#allocation15_spill]] %s1300_s0 }
   0x2   :  { %10 = vsyncpa [#allocation3], 0 }
   0x3   :  { %12 = vsyncpa [#allocation3 + $0x1], 0 }
   0x4   :  { %13 = vsyncpa [#allocation6], 0 }
   0x5   :  { %14 = vsyncpa [#allocation4], 0 }
   0x6   :  { %16 = vsyncpa [#allocation4 + $0x1], 0 }
   0x7   :  { %17 = vsyncpa [#allocation9], 0 }
   0x8   :  { %19 = vsyncpa [#allocation9 + $0x1], 0  ;;  %s1017_s15 = smov 0   ;;  %s1019_s16 = smov 0  }
   0x9   :  { %s1021_s17 = smov 0   ;;  %s1023_s18 = smov 0  }
   0xa   :  { %s1025_s19 = smov 0   ;;  %s1027_s20 = smov 0  }
   0xb LB: > { %s1048_s21 = sadd.s32 4294967295, %s980_s20   ;;  %s1308_s22 = sadd.s32 4294967294, %s980_s20   ;;  %s980_s20 = sphi %s1027_s20, %s25_s20   ;;  %s976_s19 = sphi %s1025_s19, %s1330_s19   ;;  %s972_s18 = sphi %s1023_s18, %s1329_s18   ;;  %s968_s17 = sphi %s1021_s17, %s1328_s17   ;;  %s964_s16 = sphi %s1019_s16, %s1327_s16   ;;  %s960_s15 = sphi %s1017_s15, %s1326_s15  }
   0xc   : > { %p59_p0 = scmp.ne.s32.totalorder %s964_s16, %s960_s15  ;;  %p1305_p1 = scmp.eq.s32.totalorder %s1048_s21, 0 }
   0xd   : > { %p112_p3 = scmp.eq.s32.totalorder %s1308_s22, 1  ;;  %p637_p5 = scmp.ge.s32.totalorder %s980_s20, 1 }
   0xe   : > { %p1059_p4 = por %p1305_p1, %p59_p0  ;;  %p175_p7 = scmp.lt.s32.totalorder %s980_s20, 3 }
   0xf   : > { %p1064_p6 = por %p112_p3, %p59_p0  ;;  %s982_s26 = smov [#allocation5]  }
  0x10   : > { %s1310_s23 = scalar_select %p1059_p4, 1, 0 }
  0x11   : > { %s1311_s24 = scalar_select %p1064_p6, 1, 0 }
  0x12   : > { %p1069_p8 = pnand %p637_p5, %p175_p7  ;;  %s187_s27 = sshll.u32 %s982_s26, 4  ;;  %s188_s27 = int_to_ptr.vmem [resolvable:$true] %s187_s27 }
  0x13   : > { %s37_s29 = sadd.s32 1, %s976_s19  ;;  %s776_s6 = scalar_lea.hbm %s1301_s1, 1536 }
  0x14   : > { %s1312_s25 = scalar_select %p1069_p8, 1, 0 }
  0x15   : > { %p700_p9 = pneg %p1069_p8  ;;  %p777_p12 = scmp.ne.s32.totalorder %s1301_s1, %s776_s6 }
  0x16   : > { %p783_p5 = scmp.lt.u32.totalorder %s776_s6, %s1301_s1 }
  0x17   : > { %p1078_p11 = pnand %p700_p9, %p1305_p1 }
  0x19   : > { %p778_p13 = pneg %p1078_p11 }
  0x1b   : > { %p779_p0 = pnand %p778_p13, %p777_p12 }
  0x1d   : > { %p780_p3 = pneg %p779_p0 }
  0x1f   : > { %p785_p7 = pnand %p783_p5, %p780_p3 }
  0x21   : > { %788 = shalt.err (!%p785_p7)
}
  0x22   : > { %s789_s11 = scalar_lea.vmem %s188_s27, 1536  ;;  %p797_p2 = scmp.lt.s32.totalorder %s188_s27, %s188_s27 }
  0x23   : > { %p790_p9 = scmp.ne.s32.totalorder %s188_s27, %s789_s11  ;;  %p798_p6 = scmp.lt.s32.totalorder %s789_s11, %s789_s11 }
  0x25   : > { %p792_p10 = pnand %p790_p9, %p778_p13  ;;  %p799_p4 = por %p798_p6, %p797_p2 }
  0x27   : > { %p793_p1 = pneg %p792_p10 }
  0x29   : > { %p800_p8 = pnand %p799_p4, %p793_p1 }
  0x2b   : > { %803 = shalt.err (!%p800_p8)
}
  0x2c   : > { %s983_s12 = smov 384   ;;  %s984_s13 = smov 24  }
  0x2d   : > { %703 = dma.hbm_to_vmem [thread:$0]  (!%p1078_p11), %s1301_s1, 1536, %s188_s27, [#allocation6], %s983_s12, %s983_s12, %s984_s13  }
  0x2e   : > { %p39_p1 = scmp.ge.s32.totalorder %s37_s29, 2  ;;  %s46_s30 = sadd.s32 1, %s968_s17 }
  0x2f   : > { %p53_p2 = scmp.ne.s32.totalorder %s968_s17, %s964_s16  ;;  %p54_p4 = scmp.eq.s32.totalorder %s980_s20, 0 }
  0x30   : > { %s1332_s29 = smov (%p39_p1, %s37_s29), 0  ;;  %p1315_p8 = scmp.eq.s32.totalorder %s1048_s21, 1 }
  0x31   : > { %p1105_p6 = por %p54_p4, %p53_p2  ;;  %s41_s28 = ssub.s32 %s976_s19, %s1332_s29 }
  0x32   : > { %p1111_p10 = por %p1315_p8, %p53_p2  ;;  %p719_p12 = scmp.lt.s32.totalorder %s980_s20, 2 }
  0x33   : > { %p44_p11 = scmp.eq.s32.totalorder %s41_s28, 0  ;;  %s201_s27 = sand.u32 1, %s968_s17  }
  0x34   : > { %s640_s7 = sshll.u32 %s201_s27, 3  ;;  %s641_s9 = sshll.u32 %s976_s19, 7 }
  0x35   : > { %s1120_s8 = scalar_select %p44_p11, %s968_s17, %s46_s30  }
  0x36   : > { %s1317_s0 = sld [smem:[#allocation15_spill]]  ;;  %s205_s13 = scalar_lea.vmem [#allocation2], %s640_s7 }
  0x37   : > { %s213_s14 = sshll.u32 %s205_s13, 4  ;;  %p1132_p13 = pnand %p719_p12, %p1105_p6  ;;  %s1128_s14 = int_to_ptr.vmem [resolvable:$true] %s213_s14 }
  0x38   : > { %s202_s30 = scalar_lea.sflag [#allocation3], %s201_s27 }
  0x39   : > { %p806_p3 = pneg %p1132_p13 }
  0x3c   : > { %s1126_s12 = scalar_lea.hbm %s1317_s0, %s641_s9  ;;  %s809_s10 = scalar_lea.hbm %s1317_s0, 256 }
  0x3d   : > { %s804_s28 = scalar_lea.hbm %s1126_s12, 128  ;;  %p810_p9 = scmp.lt.u32.totalorder %s1126_s12, %s1317_s0 }
  0x3e   : > { %p805_p0 = scmp.ne.s32.totalorder %s1126_s12, %s804_s28  ;;  %p811_p1 = scmp.lt.u32.totalorder %s809_s10, %s804_s28 }
  0x3f   : > { %p813_p4 = scmp.lt.u32.totalorder %s804_s28, %s1126_s12 }
  0x40   : > { %p807_p5 = pnand %p806_p3, %p805_p0  ;;  %p812_p2 = por %p811_p1, %p810_p9 }
  0x42   : > { %p808_p7 = pneg %p807_p5  ;;  %p814_p6 = por %p813_p4, %p812_p2 }
  0x44   : > { %p815_p8 = pnand %p814_p6, %p808_p7 }
  0x46   : > { %818 = shalt.err (!%p815_p8)
}
  0x47   : > { %s819_s27 = scalar_lea.vmem %s1128_s14, 128  ;;  %s985_s13 = smov [#allocation2]  }
  0x48   : > { %p820_p12 = scmp.ne.s32.totalorder %s1128_s14, %s819_s27  ;;  %s824_s7 = sshll.u32 %s985_s13, 4  ;;  %s825_s7 = int_to_ptr.vmem [resolvable:$false] %s824_s7 }
  0x49   : > { %s826_s9 = scalar_lea.vmem %s825_s7, 256  ;;  %p827_p5 = scmp.lt.s32.totalorder %s1128_s14, %s825_s7 }
  0x4a   : > { %p822_p11 = pnand %p820_p12, %p806_p3  ;;  %p828_p9 = scmp.lt.s32.totalorder %s826_s9, %s819_s27 }
  0x4c   : > { %p823_p0 = pneg %p822_p11  ;;  %p829_p1 = por %p828_p9, %p827_p5 }
  0x4e   : > { %p830_p2 = pnand %p829_p1, %p823_p0 }
  0x50   : > { %833 = shalt.err (!%p830_p2)
}
  0x51   : > { %707 = dma.hbm_to_vmem [thread:$0]  (!%p1132_p13), %s1126_s12, 128, %s1128_s14, %s202_s30  }
  0x52   : > { %p1319_p7 = scmp.ne.s32.totalorder %s1312_s25, 0 }
  0x53   : > { %s1164_s28 = sand.u32 (!%p1319_p7), 1, %s964_s16   ;;  %p1320_p3 = scmp.ne.s32.totalorder (!%p1319_p7), %s1310_s23, 0 }
  0x54   : > { %222 = sbr.rel (%p1319_p7) target bundleno = 386 (0x182), region = 28  ;;  %s1167_s10 = sshll.u32 (!%p1319_p7), %s1164_s28, 3 }
  0x55   : > { %s225_s5 = scalar_lea.sflag (!%p1319_p7), [#allocation3], %s1164_s28  ;;  %s228_s11 = scalar_lea.vmem (!%p1319_p7), [#allocation2], %s1167_s10 }
  0x5b   : > { %943 = dma.done.wait (%p1320_p3), %s225_s5, 128  }
  0x5c   : > { %945 = vsyncadd (%p1320_p3), %s225_s5, 4294967168  ;;  %p1321_p13 = scmp.eq.s32.totalorder %s1048_s21, 0 }
  0x5e   : > { %947 = dma.done.wait (%p1321_p13), [#allocation6], 1536   ;;  %p1322_p4 = pmov %p1321_p13 }
  0x5f   : > { %v986_v0 = vmov 0.0|0.0   ;;  %v987_v1 = vmov 0.0   ;;  %vm988_vm0 = vmmov 0   ;;  %v269_v2 = vld [vmem:[#allocation5 + $0x8] sm:$0xff]  ;;  %v272_v3 = vld [vmem:[#allocation5 + $0x20] sm:$0xff]  ;;  %v271_v6 = vld [vmem:[#allocation5 + $0x18] sm:$0xff] }
  0x60   : > { %949 = vsyncadd (%p1322_p4), [#allocation6], 4294965760  ;;  %682 = vmatprep.subr.bf16.mxu1 %v986_v0  ;;  %348 = vmatprep.mubr.f32.mxu0 %v987_v1  ;;  %v268_v4 = vld [vmem:[#allocation5] sm:$0xff]  ;;  %v674_v5 = vpack.c.bf16 %v272_v3, %v269_v2  ;;  %v270_v7 = vld [vmem:[#allocation5 + $0x10] sm:$0xff]  ;;  %vm280_vm1 = vcmask 261120   ;;  %s259_s23 = scalar_lea.vmem [#allocation8], %s1167_s10 }
  0x61   : > { %671 = vmatprep.mubr.msk.f32.mxu1 %vm988_vm0, %v987_v1  ;;  %v273_v8 = vld [vmem:[#allocation5 + $0x28] sm:$0xff]  ;;  %v676_v9 = vpack.c.bf16 %v271_v6, %v268_v4  ;;  %v275_v11 = vld [vmem:[#allocation5 + $0x38] sm:$0xff]  ;;  %v278_v12 = vld [vmem:[#allocation5 + $0x50] sm:$0xff]  ;;  %s468_s25 = sshll.u32 %s259_s23, 4  ;;  %s434_s12 = sand.u32 1, %s1048_s21   ;;  %s1184_s25 = int_to_ptr.vmem [resolvable:$true] %s468_s25 }
  0x62   : > { %v683_v10 = vpack.c.bf16 %v273_v8, %v270_v7  ;;  %v274_v13 = vld [vmem:[#allocation5 + $0x30] sm:$0xff]  ;;  %675 = vmatprep.subr.bf16.mxu0 %v674_v5  ;;  %v678_v14 = vpack.c.bf16 %v278_v12, %v275_v11  ;;  %v277_v15 = vld [vmem:[#allocation5 + $0x48] sm:$0xff]  ;;  %v276_v16 = vld [vmem:[#allocation5 + $0x40] sm:$0xff]  ;;  %s653_s14 = sshll.u32 %s972_s18, 7  ;;  %s252_s26 = scalar_lea.vmem [#allocation7], %s1167_s10 }
  0x63   : > { %v279_v17 = vld [vmem:[#allocation5 + $0x58] sm:$0xff]  ;;  %677 = vmatpush1.bf16.msra.mxu0 %v676_v9  ;;  %v680_v18 = vpack.c.bf16 %v277_v15, %v274_v13  ;;  %s454_s30 = sshll.u32 %s252_s26, 4  ;;  %s266_s27 = scalar_lea.vmem [#allocation10], %s1167_s10  ;;  %s1198_s30 = int_to_ptr.vmem [resolvable:$true] %s454_s30 }
  0x64   : > { %684 = vmatpush3.bf16.msra.mxu1 %v683_v10  ;;  %v686_v19 = vpack.c.bf16 %v279_v17, %v276_v16  ;;  %679 = vmatprep.subr.bf16.mxu0 %v678_v14  ;;  %v267_v20 = vld [vmem:[%s228_s11] sm:$0xff]  ;;  %s482_s13 = sshll.u32 %s266_s27, 4  ;;  %s1191_s5 = scalar_lea.hbm %s1303_s3, %s653_s14  ;;  %s1200_s13 = int_to_ptr.vmem [resolvable:$true] %s482_s13 }
  0x65   : > { %685 = vmatprep.subr.bf16.mxu1 %v986_v0  ;;  %s1196_s10 = scalar_lea.hbm %s1302_s2, %s653_s14  ;;  %s1205_s7 = scalar_lea.hbm %s1304_s4, %s653_s14 }
  0x66   : > { %s1207_s9 = scalar_lea.sflag [#allocation9], %s434_s12  ;;  %s989_s18 = smov [#allocation8]  }
  0x67   : > { %681 = vmatpush1.bf16.msra.mxu0 %v680_v18  ;;  %s838_s21 = sshll.u32 %s989_s18, 4  ;;  %s839_s21 = int_to_ptr.vmem [resolvable:$false] %s838_s21 }
  0x68   : > { %687 = vmatpush3.bf16.msra.mxu1 %v686_v19  ;;  %s840_s0 = scalar_lea.vmem %s839_s21, 256  ;;  %p841_p11 = scmp.lt.s32.totalorder %s1184_s25, %s839_s21 }
  0x6a   : > { %648 = vmatmul.mubr.msk.f32.vlgmr.msra.gmra.mrb[0].mxu0 %vm280_vm1, %v267_v20 }
  0x6b   : > { %672 = vmatmul.mubr.msk.f32.vlgmr.msra.gmra.mrb[0].mxu1 %vm280_vm1, %v267_v20 }
 0x13d   : > { %v350_v21 = vpop.f32.mrb[0].mxu0 }
 0x13e   : > { %v421_v22 = vpop.f32.mrb[0].mxu1  ;;  %v425_v23 = vmul.f32 0.25, %v350_v21  ;;  %v352_v24 = vpop.f32.mrb[1].mxu0 }
 0x13f   : > { %428 = vst [vmem:[%s266_s27] sm:$0xff] %v421_v22  ;;  %v673_v25 = vpop.f32.mrb[1].mxu1  ;;  %427 = vst [vmem:[%s259_s23] sm:$0xff] %v352_v24  ;;  %s834_s27 = scalar_lea.vmem %s1184_s25, 128 }
 0x140   : > { %426 = vst [vmem:[%s252_s26] sm:$0xff] %v425_v23  ;;  %p835_p6 = scmp.ne.s32.totalorder %s1184_s25, %s834_s27  ;;  %p842_p0 = scmp.lt.s32.totalorder %s840_s0, %s834_s27 }
 0x142   : > { %p836_p8 = pnand %p835_p6, %p1111_p10  ;;  %p843_p5 = por %p842_p0, %p841_p11 }
 0x144   : > { %p837_p12 = pneg %p836_p8 }
 0x146   : > { %p844_p9 = pnand %p843_p5, %p837_p12 }
 0x148   : > { %847 = shalt.err (!%p844_p9)
}
 0x149   : > { %s848_s22 = scalar_lea.hbm %s1191_s5, 128  ;;  %s852_s14 = scalar_lea.hbm %s1303_s3, 256 }
 0x14a   : > { %p849_p1 = scmp.ne.s32.totalorder %s1191_s5, %s848_s22  ;;  %p853_p3 = scmp.lt.u32.totalorder %s1191_s5, %s1303_s3 }
 0x14b   : > { %p854_p13 = scmp.lt.u32.totalorder %s852_s14, %s848_s22  ;;  %p856_p6 = scmp.lt.u32.totalorder %s848_s22, %s1191_s5 }
 0x14c   : > { %p850_p2 = pnand %p849_p1, %p1111_p10 }
 0x14d   : > { %p855_p4 = por %p854_p13, %p853_p3 }
 0x14e   : > { %p851_p7 = pneg %p850_p2 }
 0x14f   : > { %p857_p8 = por %p856_p6, %p855_p4 }
 0x151   : > { %p858_p12 = pnand %p857_p8, %p851_p7 }
 0x153   : > { %861 = shalt.err (!%p858_p12)
}
 0x154   : > { %695 = dma.vmem_to_hbm [thread:$0]  (%p1111_p10), %s1184_s25, 128, %s1191_s5, %s1207_s9  }
 0x155   : > { %s430_s0 = scalar_lea.sflag [#allocation4], %s1164_s28  ;;  %s862_s27 = scalar_lea.vmem %s1198_s30, 128 }
 0x156   : > { %p863_p11 = scmp.ne.s32.totalorder %s1198_s30, %s862_s27  ;;  %s990_s18 = smov [#allocation7]  }
 0x157   : > { %s866_s21 = sshll.u32 %s990_s18, 4  ;;  %s867_s21 = int_to_ptr.vmem [resolvable:$false] %s866_s21 }
 0x158   : > { %p864_p0 = pnand %p863_p11, %p1111_p10  ;;  %s868_s22 = scalar_lea.vmem %s867_s21, 256 }
 0x159   : > { %p869_p9 = scmp.lt.s32.totalorder %s1198_s30, %s867_s21  ;;  %p870_p1 = scmp.lt.s32.totalorder %s868_s22, %s862_s27 }
 0x15a   : > { %p865_p5 = pneg %p864_p0 }
 0x15b   : > { %p871_p2 = por %p870_p1, %p869_p9 }
 0x15d   : > { %p872_p7 = pnand %p871_p2, %p865_p5 }
 0x15f   : > { %875 = shalt.err (!%p872_p7)
}
 0x160   : > { %s876_s28 = scalar_lea.hbm %s1196_s10, 128  ;;  %s880_s23 = scalar_lea.hbm %s1302_s2, 256 }
 0x161   : > { %p877_p3 = scmp.ne.s32.totalorder %s1196_s10, %s876_s28  ;;  %p881_p6 = scmp.lt.u32.totalorder %s1196_s10, %s1302_s2 }
 0x162   : > { %p882_p8 = scmp.lt.u32.totalorder %s880_s23, %s876_s28  ;;  %p884_p11 = scmp.lt.u32.totalorder %s876_s28, %s1196_s10 }
 0x163   : > { %p878_p13 = pnand %p877_p3, %p1111_p10 }
 0x164   : > { %p883_p12 = por %p882_p8, %p881_p6 }
 0x165   : > { %p879_p4 = pneg %p878_p13 }
 0x166   : > { %p885_p0 = por %p884_p11, %p883_p12 }
 0x168   : > { %p886_p5 = pnand %p885_p0, %p879_p4 }
 0x16a   : > { %889 = shalt.err (!%p886_p5)
}
 0x16b   : > { %694 = dma.vmem_to_hbm [thread:$0]  (%p1111_p10), %s1198_s30, 128, %s1196_s10, %s430_s0  }
 0x16c   : > { %s890_s26 = scalar_lea.vmem %s1200_s13, 128  ;;  %s991_s11 = smov [#allocation10]  }
 0x16d   : > { %p891_p9 = scmp.ne.s32.totalorder %s1200_s13, %s890_s26  ;;  %s894_s27 = sshll.u32 %s991_s11, 4  ;;  %s895_s27 = int_to_ptr.vmem [resolvable:$false] %s894_s27 }
 0x16e   : > { %s896_s18 = scalar_lea.vmem %s895_s27, 256  ;;  %p897_p7 = scmp.lt.s32.totalorder %s1200_s13, %s895_s27 }
 0x16f   : > { %p892_p1 = pnand %p891_p9, %p1111_p10  ;;  %p898_p3 = scmp.lt.s32.totalorder %s896_s18, %s890_s26 }
 0x171   : > { %p893_p2 = pneg %p892_p1  ;;  %p899_p13 = por %p898_p3, %p897_p7 }
 0x173   : > { %p900_p4 = pnand %p899_p13, %p893_p2 }
 0x175   : > { %903 = shalt.err (!%p900_p4)
}
 0x176   : > { %s904_s30 = scalar_lea.hbm %s1205_s7, 128  ;;  %s908_s21 = scalar_lea.hbm %s1304_s4, 256 }
 0x177   : > { %p905_p6 = scmp.ne.s32.totalorder %s1205_s7, %s904_s30  ;;  %p909_p11 = scmp.lt.u32.totalorder %s1205_s7, %s1304_s4 }
 0x178   : > { %p910_p0 = scmp.lt.u32.totalorder %s908_s21, %s904_s30  ;;  %p912_p9 = scmp.lt.u32.totalorder %s904_s30, %s1205_s7 }
 0x179   : > { %p906_p8 = pnand %p905_p6, %p1111_p10 }
 0x17a   : > { %p911_p5 = por %p910_p0, %p909_p11 }
 0x17b   : > { %p907_p12 = pneg %p906_p8 }
 0x17c   : > { %p913_p1 = por %p912_p9, %p911_p5 }
 0x17e   : > { %p914_p2 = pnand %p913_p1, %p907_p12 }
 0x180   : > { %917 = shalt.err (!%p914_p2)
}
 0x181   : > { %696 = dma.vmem_to_hbm [thread:$0]  (%p1111_p10), %s1200_s13, 128, %s1205_s7, %s1207_s9  }
 0x182 PF: > { %s494_s25 = sand.u32 1, %s960_s15   ;;  %p1323_p7 = scmp.ne.s32.totalorder %s1311_s24, 0 }
 0x183   : > { %p1324_p3 = scmp.ge.s32.totalorder %s980_s20, 2  ;;  %s495_s5 = scalar_lea.sflag [#allocation4], %s494_s25 }
 0x185   : > { %p709_p13 = pnand %p1324_p3, %p1323_p7 }
 0x187   : > { %951 = dma.done.wait (!%p709_p13), %s495_s5, 128  }
 0x188   : > { %953 = vsyncadd (!%p709_p13), %s495_s5, 4294967168  ;;  %s1325_s23 = sadd.s32 4294967294, %s980_s20  }
 0x189   : > { %s503_s12 = sand.u32 1, %s1325_s23  }
 0x18a   : > { %s504_s14 = scalar_lea.sflag [#allocation9], %s503_s12 }
 0x18b   : > { %955 = dma.done.wait (!%p709_p13), %s504_s14, 256  }
 0x18c   : > { %957 = vsyncadd (!%p709_p13), %s504_s14, 4294967040  ;;  %s25_s20 = sadd.s32 1, %s980_s20   ;;  %s1326_s15 = smov %s964_s16 }
 0x18d   : > { %p22_p10 = scmp.ge.s32.totalorder %s25_s20, 4   ;;  %s1327_s16 = smov %s968_s17 }
 0x18e   : > { %s1328_s17 = smov %s1120_s8  ;;  %s1329_s18 = smov %s976_s19 }
 0x18f   : > { %s1330_s19 = smov %s1332_s29  ;;  %24 = sbr.rel (!%p22_p10) target bundleno = 11 (0xb), region = 109 }
 0x196   :  { %518 = vsyncpa [#allocation3], 1 }
 0x197   :  { %520 = vsyncpa [#allocation3 + $0x1], 1 }
 0x198   :  { %521 = vsyncpa [#allocation6], 1 }
 0x199   :  { %522 = vsyncpa [#allocation4], 1 }
 0x19a   :  { %524 = vsyncpa [#allocation4 + $0x1], 1 }
 0x19b   :  { %525 = vsyncpa [#allocation9], 1 }
 0x19c   :  { %527 = vsyncpa [#allocation9 + $0x1], 1 }

// kernel: tpu_custom_call.1
= control target key start
LH: loop header
LB: loop body
LE: loop exit
PB: predicated region body
PF: predicated region fallthrough
CT: control target
= control target key end

     0   :  { %s1300_s0 = inlined_call_operand.hbm [shape: f32[2,8,32], index: 0, kind: input, shape index: {}]   ;;  %s1301_s1 = inlined_call_operand.hbm [shape: f32[32,384], index: 1, kind: input, shape index: {}]   ;;  %s1302_s2 = inlined_call_operand.hbm [shape: f32[2,8,128], index: 2, kind: output, shape index: {0}]   ;;  %s1303_s3 = inlined_call_operand.hbm [shape: f32[2,8,128], index: 3, kind: output, shape index: {1}]   ;;  %s1304_s4 = inlined_call_operand.hbm [shape: f32[2,8,128], index: 4, kind: output, shape index: {2}]  }
   0x1   :  { %1309 = sst [smem:[#allocation15_spill]] %s1300_s0 }
   0x2   :  { %10 = vsyncpa [#allocation3], 0 }
   0x3   :  { %12 = vsyncpa [#allocation3 + $0x1], 0 }
   0x4   :  { %13 = vsyncpa [#allocation6], 0 }
   0x5   :  { %14 = vsyncpa [#allocation4], 0 }
   0x6   :  { %16 = vsyncpa [#allocation4 + $0x1], 0 }
   0x7   :  { %17 = vsyncpa [#allocation9], 0 }
   0x8   :  { %19 = vsyncpa [#allocation9 + $0x1], 0  ;;  %s1017_s15 = smov 0   ;;  %s1019_s16 = smov 0  }
   0x9   :  { %s1021_s17 = smov 0   ;;  %s1023_s18 = smov 0  }
   0xa   :  { %s1025_s19 = smov 0   ;;  %s1027_s20 = smov 0  }
   0xb LB: > { %s1048_s21 = sadd.s32 4294967295, %s980_s20   ;;  %s1308_s22 = sadd.s32 4294967294, %s980_s20   ;;  %s980_s20 = sphi %s1027_s20, %s25_s20   ;;  %s976_s19 = sphi %s1025_s19, %s1330_s19   ;;  %s972_s18 = sphi %s1023_s18, %s1329_s18   ;;  %s968_s17 = sphi %s1021_s17, %s1328_s17   ;;  %s964_s16 = sphi %s1019_s16, %s1327_s16   ;;  %s960_s15 = sphi %s1017_s15, %s1326_s15  }
   0xc   : > { %p59_p0 = scmp.ne.s32.totalorder %s964_s16, %s960_s15  ;;  %p1305_p1 = scmp.eq.s32.totalorder %s1048_s21, 0 }
   0xd   : > { %p112_p3 = scmp.eq.s32.totalorder %s1308_s22, 1  ;;  %p637_p5 = scmp.ge.s32.totalorder %s980_s20, 1 }
   0xe   : > { %p1059_p4 = por %p1305_p1, %p59_p0  ;;  %p175_p7 = scmp.lt.s32.totalorder %s980_s20, 3 }
   0xf   : > { %p1064_p6 = por %p112_p3, %p59_p0  ;;  %s982_s26 = smov [#allocation5]  }
  0x10   : > { %s1310_s23 = scalar_select %p1059_p4, 1, 0 }
  0x11   : > { %s1311_s24 = scalar_select %p1064_p6, 1, 0 }
  0x12   : > { %p1069_p8 = pnand %p637_p5, %p175_p7  ;;  %s187_s27 = sshll.u32 %s982_s26, 4  ;;  %s188_s27 = int_to_ptr.vmem [resolvable:$true] %s187_s27 }
  0x13   : > { %s37_s29 = sadd.s32 1, %s976_s19  ;;  %s776_s6 = scalar_lea.hbm %s1301_s1, 1536 }
  0x14   : > { %s1312_s25 = scalar_select %p1069_p8, 1, 0 }
  0x15   : > { %p700_p9 = pneg %p1069_p8  ;;  %p777_p12 = scmp.ne.s32.totalorder %s1301_s1, %s776_s6 }
  0x16   : > { %p783_p5 = scmp.lt.u32.totalorder %s776_s6, %s1301_s1 }
  0x17   : > { %p1078_p11 = pnand %p700_p9, %p1305_p1 }
  0x19   : > { %p778_p13 = pneg %p1078_p11 }
  0x1b   : > { %p779_p0 = pnand %p778_p13, %p777_p12 }
  0x1d   : > { %p780_p3 = pneg %p779_p0 }
  0x1f   : > { %p785_p7 = pnand %p783_p5, %p780_p3 }
  0x21   : > { %788 = shalt.err (!%p785_p7)
}
  0x22   : > { %s789_s11 = scalar_lea.vmem %s188_s27, 1536  ;;  %p797_p2 = scmp.lt.s32.totalorder %s188_s27, %s188_s27 }
  0x23   : > { %p790_p9 = scmp.ne.s32.totalorder %s188_s27, %s789_s11  ;;  %p798_p6 = scmp.lt.s32.totalorder %s789_s11, %s789_s11 }
  0x25   : > { %p792_p10 = pnand %p790_p9, %p778_p13  ;;  %p799_p4 = por %p798_p6, %p797_p2 }
  0x27   : > { %p793_p1 = pneg %p792_p10 }
  0x29   : > { %p800_p8 = pnand %p799_p4, %p793_p1 }
  0x2b   : > { %803 = shalt.err (!%p800_p8)
}
  0x2c   : > { %s983_s12 = smov 384   ;;  %s984_s13 = smov 24  }
  0x2d   : > { %703 = dma.hbm_to_vmem [thread:$0]  (!%p1078_p11), %s1301_s1, 1536, %s188_s27, [#allocation6], %s983_s12, %s983_s12, %s984_s13  }
  0x2e   : > { %p39_p1 = scmp.ge.s32.totalorder %s37_s29, 2  ;;  %s46_s30 = sadd.s32 1, %s968_s17 }
  0x2f   : > { %p53_p2 = scmp.ne.s32.totalorder %s968_s17, %s964_s16  ;;  %p54_p4 = scmp.eq.s32.totalorder %s980_s20, 0 }
  0x30   : > { %s1332_s29 = smov (%p39_p1, %s37_s29), 0  ;;  %p1315_p8 = scmp.eq.s32.totalorder %s1048_s21, 1 }
  0x31   : > { %p1105_p6 = por %p54_p4, %p53_p2  ;;  %s41_s28 = ssub.s32 %s976_s19, %s1332_s29 }
  0x32   : > { %p1111_p10 = por %p1315_p8, %p53_p2  ;;  %p719_p12 = scmp.lt.s32.totalorder %s980_s20, 2 }
  0x33   : > { %p44_p11 = scmp.eq.s32.totalorder %s41_s28, 0  ;;  %s201_s27 = sand.u32 1, %s968_s17  }
  0x34   : > { %s640_s7 = sshll.u32 %s201_s27, 3  ;;  %s641_s9 = sshll.u32 %s976_s19, 7 }
  0x35   : > { %s1120_s8 = scalar_select %p44_p11, %s968_s17, %s46_s30  }
  0x36   : > { %s1317_s0 = sld [smem:[#allocation15_spill]]  ;;  %s205_s13 = scalar_lea.vmem [#allocation2], %s640_s7 }
  0x37   : > { %s213_s14 = sshll.u32 %s205_s13, 4  ;;  %p1132_p13 = pnand %p719_p12, %p1105_p6  ;;  %s1128_s14 = int_to_ptr.vmem [resolvable:$true] %s213_s14 }
  0x38   : > { %s202_s30 = scalar_lea.sflag [#allocation3], %s201_s27 }
  0x39   : > { %p806_p3 = pneg %p1132_p13 }
  0x3c   : > { %s1126_s12 = scalar_lea.hbm %s1317_s0, %s641_s9  ;;  %s809_s10 = scalar_lea.hbm %s1317_s0, 256 }
  0x3d   : > { %s804_s28 = scalar_lea.hbm %s1126_s12, 128  ;;  %p810_p9 = scmp.lt.u32.totalorder %s1126_s12, %s1317_s0 }
  0x3e   : > { %p805_p0 = scmp.ne.s32.totalorder %s1126_s12, %s804_s28  ;;  %p811_p1 = scmp.lt.u32.totalorder %s809_s10, %s804_s28 }
  0x3f   : > { %p813_p4 = scmp.lt.u32.totalorder %s804_s28, %s1126_s12 }
  0x40   : > { %p807_p5 = pnand %p806_p3, %p805_p0  ;;  %p812_p2 = por %p811_p1, %p810_p9 }
  0x42   : > { %p808_p7 = pneg %p807_p5  ;;  %p814_p6 = por %p813_p4, %p812_p2 }
  0x44   : > { %p815_p8 = pnand %p814_p6, %p808_p7 }
  0x46   : > { %818 = shalt.err (!%p815_p8)
}
  0x47   : > { %s819_s27 = scalar_lea.vmem %s1128_s14, 128  ;;  %s985_s13 = smov [#allocation2]  }
  0x48   : > { %p820_p12 = scmp.ne.s32.totalorder %s1128_s14, %s819_s27  ;;  %s824_s7 = sshll.u32 %s985_s13, 4  ;;  %s825_s7 = int_to_ptr.vmem [resolvable:$false] %s824_s7 }
  0x49   : > { %s826_s9 = scalar_lea.vmem %s825_s7, 256  ;;  %p827_p5 = scmp.lt.s32.totalorder %s1128_s14, %s825_s7 }
  0x4a   : > { %p822_p11 = pnand %p820_p12, %p806_p3  ;;  %p828_p9 = scmp.lt.s32.totalorder %s826_s9, %s819_s27 }
  0x4c   : > { %p823_p0 = pneg %p822_p11  ;;  %p829_p1 = por %p828_p9, %p827_p5 }
  0x4e   : > { %p830_p2 = pnand %p829_p1, %p823_p0 }
  0x50   : > { %833 = shalt.err (!%p830_p2)
}
  0x51   : > { %707 = dma.hbm_to_vmem [thread:$0]  (!%p1132_p13), %s1126_s12, 128, %s1128_s14, %s202_s30  }
  0x52   : > { %p1319_p7 = scmp.ne.s32.totalorder %s1312_s25, 0 }
  0x53   : > { %s1164_s28 = sand.u32 (!%p1319_p7), 1, %s964_s16   ;;  %p1320_p3 = scmp.ne.s32.totalorder (!%p1319_p7), %s1310_s23, 0 }
  0x54   : > { %222 = sbr.rel (%p1319_p7) target bundleno = 386 (0x182), region = 28  ;;  %s1167_s10 = sshll.u32 (!%p1319_p7), %s1164_s28, 3 }
  0x55   : > { %s225_s5 = scalar_lea.sflag (!%p1319_p7), [#allocation3], %s1164_s28  ;;  %s228_s11 = scalar_lea.vmem (!%p1319_p7), [#allocation2], %s1167_s10 }
  0x5b   : > { %943 = dma.done.wait (%p1320_p3), %s225_s5, 128  }
  0x5c   : > { %945 = vsyncadd (%p1320_p3), %s225_s5, 4294967168  ;;  %p1321_p13 = scmp.eq.s32.totalorder %s1048_s21, 0 }
  0x5e   : > { %947 = dma.done.wait (%p1321_p13), [#allocation6], 1536   ;;  %p1322_p4 = pmov %p1321_p13 }
  0x5f   : > { %v986_v0 = vmov 0.0|0.0   ;;  %v987_v1 = vmov 0.0   ;;  %vm988_vm0 = vmmov 0   ;;  %v269_v2 = vld [vmem:[#allocation5 + $0x8] sm:$0xff]  ;;  %v272_v3 = vld [vmem:[#allocation5 + $0x20] sm:$0xff]  ;;  %v271_v6 = vld [vmem:[#allocation5 + $0x18] sm:$0xff] }
  0x60   : > { %949 = vsyncadd (%p1322_p4), [#allocation6], 4294965760  ;;  %682 = vmatprep.subr.bf16.mxu1 %v986_v0  ;;  %348 = vmatprep.mubr.f32.mxu0 %v987_v1  ;;  %v268_v4 = vld [vmem:[#allocation5] sm:$0xff]  ;;  %v674_v5 = vpack.c.bf16 %v272_v3, %v269_v2  ;;  %v270_v7 = vld [vmem:[#allocation5 + $0x10] sm:$0xff]  ;;  %vm280_vm1 = vcmask 261120   ;;  %s259_s23 = scalar_lea.vmem [#allocation8], %s1167_s10 }
  0x61   : > { %671 = vmatprep.mubr.msk.f32.mxu1 %vm988_vm0, %v987_v1  ;;  %v273_v8 = vld [vmem:[#allocation5 + $0x28] sm:$0xff]  ;;  %v676_v9 = vpack.c.bf16 %v271_v6, %v268_v4  ;;  %v275_v11 = vld [vmem:[#allocation5 + $0x38] sm:$0xff]  ;;  %v278_v12 = vld [vmem:[#allocation5 + $0x50] sm:$0xff]  ;;  %s468_s25 = sshll.u32 %s259_s23, 4  ;;  %s434_s12 = sand.u32 1, %s1048_s21   ;;  %s1184_s25 = int_to_ptr.vmem [resolvable:$true] %s468_s25 }
  0x62   : > { %v683_v10 = vpack.c.bf16 %v273_v8, %v270_v7  ;;  %v274_v13 = vld [vmem:[#allocation5 + $0x30] sm:$0xff]  ;;  %675 = vmatprep.subr.bf16.mxu0 %v674_v5  ;;  %v678_v14 = vpack.c.bf16 %v278_v12, %v275_v11  ;;  %v277_v15 = vld [vmem:[#allocation5 + $0x48] sm:$0xff]  ;;  %v276_v16 = vld [vmem:[#allocation5 + $0x40] sm:$0xff]  ;;  %s653_s14 = sshll.u32 %s972_s18, 7  ;;  %s252_s26 = scalar_lea.vmem [#allocation7], %s1167_s10 }
  0x63   : > { %v279_v17 = vld [vmem:[#allocation5 + $0x58] sm:$0xff]  ;;  %677 = vmatpush1.bf16.msra.mxu0 %v676_v9  ;;  %v680_v18 = vpack.c.bf16 %v277_v15, %v274_v13  ;;  %s454_s30 = sshll.u32 %s252_s26, 4  ;;  %s266_s27 = scalar_lea.vmem [#allocation10], %s1167_s10  ;;  %s1198_s30 = int_to_ptr.vmem [resolvable:$true] %s454_s30 }
  0x64   : > { %684 = vmatpush3.bf16.msra.mxu1 %v683_v10  ;;  %v686_v19 = vpack.c.bf16 %v279_v17, %v276_v16  ;;  %679 = vmatprep.subr.bf16.mxu0 %v678_v14  ;;  %v267_v20 = vld [vmem:[%s228_s11] sm:$0xff]  ;;  %s482_s13 = sshll.u32 %s266_s27, 4  ;;  %s1191_s5 = scalar_lea.hbm %s1303_s3, %s653_s14  ;;  %s1200_s13 = int_to_ptr.vmem [resolvable:$true] %s482_s13 }
  0x65   : > { %685 = vmatprep.subr.bf16.mxu1 %v986_v0  ;;  %s1196_s10 = scalar_lea.hbm %s1302_s2, %s653_s14  ;;  %s1205_s7 = scalar_lea.hbm %s1304_s4, %s653_s14 }
  0x66   : > { %s1207_s9 = scalar_lea.sflag [#allocation9], %s434_s12  ;;  %s989_s18 = smov [#allocation8]  }
  0x67   : > { %681 = vmatpush1.bf16.msra.mxu0 %v680_v18  ;;  %s838_s21 = sshll.u32 %s989_s18, 4  ;;  %s839_s21 = int_to_ptr.vmem [resolvable:$false] %s838_s21 }
  0x68   : > { %687 = vmatpush3.bf16.msra.mxu1 %v686_v19  ;;  %s840_s0 = scalar_lea.vmem %s839_s21, 256  ;;  %p841_p11 = scmp.lt.s32.totalorder %s1184_s25, %s839_s21 }
  0x6a   : > { %648 = vmatmul.mubr.msk.f32.vlgmr.msra.gmra.mrb[0].mxu0 %vm280_vm1, %v267_v20 }
  0x6b   : > { %672 = vmatmul.mubr.msk.f32.vlgmr.msra.gmra.mrb[0].mxu1 %vm280_vm1, %v267_v20 }
 0x13d   : > { %v350_v21 = vpop.f32.mrb[0].mxu0 }
 0x13e   : > { %v421_v22 = vpop.f32.mrb[0].mxu1  ;;  %v425_v23 = vmul.f32 0.25, %v350_v21  ;;  %v352_v24 = vpop.f32.mrb[1].mxu0 }
 0x13f   : > { %428 = vst [vmem:[%s266_s27] sm:$0xff] %v421_v22  ;;  %v673_v25 = vpop.f32.mrb[1].mxu1  ;;  %427 = vst [vmem:[%s259_s23] sm:$0xff] %v352_v24  ;;  %s834_s27 = scalar_lea.vmem %s1184_s25, 128 }
 0x140   : > { %426 = vst [vmem:[%s252_s26] sm:$0xff] %v425_v23  ;;  %p835_p6 = scmp.ne.s32.totalorder %s1184_s25, %s834_s27  ;;  %p842_p0 = scmp.lt.s32.totalorder %s840_s0, %s834_s27 }
 0x142   : > { %p836_p8 = pnand %p835_p6, %p1111_p10  ;;  %p843_p5 = por %p842_p0, %p841_p11 }
 0x144   : > { %p837_p12 = pneg %p836_p8 }
 0x146   : > { %p844_p9 = pnand %p843_p5, %p837_p12 }
 0x148   : > { %847 = shalt.err (!%p844_p9)
}
 0x149   : > { %s848_s22 = scalar_lea.hbm %s1191_s5, 128  ;;  %s852_s14 = scalar_lea.hbm %s1303_s3, 256 }
 0x14a   : > { %p849_p1 = scmp.ne.s32.totalorder %s1191_s5, %s848_s22  ;;  %p853_p3 = scmp.lt.u32.totalorder %s1191_s5, %s1303_s3 }
 0x14b   : > { %p854_p13 = scmp.lt.u32.totalorder %s852_s14, %s848_s22  ;;  %p856_p6 = scmp.lt.u32.totalorder %s848_s22, %s1191_s5 }
 0x14c   : > { %p850_p2 = pnand %p849_p1, %p1111_p10 }
 0x14d   : > { %p855_p4 = por %p854_p13, %p853_p3 }
 0x14e   : > { %p851_p7 = pneg %p850_p2 }
 0x14f   : > { %p857_p8 = por %p856_p6, %p855_p4 }
 0x151   : > { %p858_p12 = pnand %p857_p8, %p851_p7 }
 0x153   : > { %861 = shalt.err (!%p858_p12)
}
 0x154   : > { %695 = dma.vmem_to_hbm [thread:$0]  (%p1111_p10), %s1184_s25, 128, %s1191_s5, %s1207_s9  }
 0x155   : > { %s430_s0 = scalar_lea.sflag [#allocation4], %s1164_s28  ;;  %s862_s27 = scalar_lea.vmem %s1198_s30, 128 }
 0x156   : > { %p863_p11 = scmp.ne.s32.totalorder %s1198_s30, %s862_s27  ;;  %s990_s18 = smov [#allocation7]  }
 0x157   : > { %s866_s21 = sshll.u32 %s990_s18, 4  ;;  %s867_s21 = int_to_ptr.vmem [resolvable:$false] %s866_s21 }
 0x158   : > { %p864_p0 = pnand %p863_p11, %p1111_p10  ;;  %s868_s22 = scalar_lea.vmem %s867_s21, 256 }
 0x159   : > { %p869_p9 = scmp.lt.s32.totalorder %s1198_s30, %s867_s21  ;;  %p870_p1 = scmp.lt.s32.totalorder %s868_s22, %s862_s27 }
 0x15a   : > { %p865_p5 = pneg %p864_p0 }
 0x15b   : > { %p871_p2 = por %p870_p1, %p869_p9 }
 0x15d   : > { %p872_p7 = pnand %p871_p2, %p865_p5 }
 0x15f   : > { %875 = shalt.err (!%p872_p7)
}
 0x160   : > { %s876_s28 = scalar_lea.hbm %s1196_s10, 128  ;;  %s880_s23 = scalar_lea.hbm %s1302_s2, 256 }
 0x161   : > { %p877_p3 = scmp.ne.s32.totalorder %s1196_s10, %s876_s28  ;;  %p881_p6 = scmp.lt.u32.totalorder %s1196_s10, %s1302_s2 }
 0x162   : > { %p882_p8 = scmp.lt.u32.totalorder %s880_s23, %s876_s28  ;;  %p884_p11 = scmp.lt.u32.totalorder %s876_s28, %s1196_s10 }
 0x163   : > { %p878_p13 = pnand %p877_p3, %p1111_p10 }
 0x164   : > { %p883_p12 = por %p882_p8, %p881_p6 }
 0x165   : > { %p879_p4 = pneg %p878_p13 }
 0x166   : > { %p885_p0 = por %p884_p11, %p883_p12 }
 0x168   : > { %p886_p5 = pnand %p885_p0, %p879_p4 }
 0x16a   : > { %889 = shalt.err (!%p886_p5)
}
 0x16b   : > { %694 = dma.vmem_to_hbm [thread:$0]  (%p1111_p10), %s1198_s30, 128, %s1196_s10, %s430_s0  }
 0x16c   : > { %s890_s26 = scalar_lea.vmem %s1200_s13, 128  ;;  %s991_s11 = smov [#allocation10]  }
 0x16d   : > { %p891_p9 = scmp.ne.s32.totalorder %s1200_s13, %s890_s26  ;;  %s894_s27 = sshll.u32 %s991_s11, 4  ;;  %s895_s27 = int_to_ptr.vmem [resolvable:$false] %s894_s27 }
 0x16e   : > { %s896_s18 = scalar_lea.vmem %s895_s27, 256  ;;  %p897_p7 = scmp.lt.s32.totalorder %s1200_s13, %s895_s27 }
 0x16f   : > { %p892_p1 = pnand %p891_p9, %p1111_p10  ;;  %p898_p3 = scmp.lt.s32.totalorder %s896_s18, %s890_s26 }
 0x171   : > { %p893_p2 = pneg %p892_p1  ;;  %p899_p13 = por %p898_p3, %p897_p7 }
 0x173   : > { %p900_p4 = pnand %p899_p13, %p893_p2 }
 0x175   : > { %903 = shalt.err (!%p900_p4)
}
 0x176   : > { %s904_s30 = scalar_lea.hbm %s1205_s7, 128  ;;  %s908_s21 = scalar_lea.hbm %s1304_s4, 256 }
 0x177   : > { %p905_p6 = scmp.ne.s32.totalorder %s1205_s7, %s904_s30  ;;  %p909_p11 = scmp.lt.u32.totalorder %s1205_s7, %s1304_s4 }
 0x178   : > { %p910_p0 = scmp.lt.u32.totalorder %s908_s21, %s904_s30  ;;  %p912_p9 = scmp.lt.u32.totalorder %s904_s30, %s1205_s7 }
 0x179   : > { %p906_p8 = pnand %p905_p6, %p1111_p10 }
 0x17a   : > { %p911_p5 = por %p910_p0, %p909_p11 }
 0x17b   : > { %p907_p12 = pneg %p906_p8 }
 0x17c   : > { %p913_p1 = por %p912_p9, %p911_p5 }
 0x17e   : > { %p914_p2 = pnand %p913_p1, %p907_p12 }
 0x180   : > { %917 = shalt.err (!%p914_p2)
}
 0x181   : > { %696 = dma.vmem_to_hbm [thread:$0]  (%p1111_p10), %s1200_s13, 128, %s1205_s7, %s1207_s9  }
 0x182 PF: > { %s494_s25 = sand.u32 1, %s960_s15   ;;  %p1323_p7 = scmp.ne.s32.totalorder %s1311_s24, 0 }
 0x183   : > { %p1324_p3 = scmp.ge.s32.totalorder %s980_s20, 2  ;;  %s495_s5 = scalar_lea.sflag [#allocation4], %s494_s25 }
 0x185   : > { %p709_p13 = pnand %p1324_p3, %p1323_p7 }
 0x187   : > { %951 = dma.done.wait (!%p709_p13), %s495_s5, 128  }
 0x188   : > { %953 = vsyncadd (!%p709_p13), %s495_s5, 4294967168  ;;  %s1325_s23 = sadd.s32 4294967294, %s980_s20  }
 0x189   : > { %s503_s12 = sand.u32 1, %s1325_s23  }
 0x18a   : > { %s504_s14 = scalar_lea.sflag [#allocation9], %s503_s12 }
 0x18b   : > { %955 = dma.done.wait (!%p709_p13), %s504_s14, 256  }
 0x18c   : > { %957 = vsyncadd (!%p709_p13), %s504_s14, 4294967040  ;;  %s25_s20 = sadd.s32 1, %s980_s20   ;;  %s1326_s15 = smov %s964_s16 }
 0x18d   : > { %p22_p10 = scmp.ge.s32.totalorder %s25_s20, 4   ;;  %s1327_s16 = smov %s968_s17 }
 0x18e   : > { %s1328_s17 = smov %s1120_s8  ;;  %s1329_s18 = smov %s976_s19 }
 0x18f   : > { %s1330_s19 = smov %s1332_s29  ;;  %24 = sbr.rel (!%p22_p10) target bundleno = 11 (0xb), region = 109 }
 0x196   :  { %518 = vsyncpa [#allocation3], 1 }
 0x197   :  { %520 = vsyncpa [#allocation3 + $0x1], 1 }
 0x198   :  { %521 = vsyncpa [#allocation6], 1 }
 0x199   :  { %522 = vsyncpa [#allocation4], 1 }
 0x19a   :  { %524 = vsyncpa [#allocation4 + $0x1], 1 }
 0x19b   :  { %525 = vsyncpa [#allocation9], 1 }
 0x19c   :  { %527 = vsyncpa [#allocation9 + $0x1], 1 }

</bundles_post_ra>
